<compile_context>
chip_gen: v7x
topology: tpu7x:2x2x1
jax: 0.10.0
libtpu: 0.0.40
codegen_flags: <defaults>
</compile_context>

<pallas_src>
import functools

import jax
import jax.numpy as jnp
from jax.experimental import pallas as pl
from jax.experimental.pallas import tpu as pltpu

KSIZE = 5
STRIDE = 2
PAD = KSIZE // 2  # = 2


# --------------------------- device-aware sizing ----------------------------

def _round_up(x, m):
    return ((x + m - 1) // m) * m


def _vmem_capacity():
    cap = 64 * 1024 * 1024  # conservative default (v7x per-core VMEM)
    try:
        cap = int(getattr(pltpu.get_tpu_info(), "vmem_capacity_bytes", cap))
    except Exception:
        pass
    if not cap or cap <= 0:
        cap = 64 * 1024 * 1024
    return cap


def _vmem_limit_bytes():
    # ~3/4 of physical VMEM, with headroom below 96 MiB for compiler scratch.
    return int(min(_vmem_capacity() * 3 // 4, 90 * 1024 * 1024))


def _max_pixels():
    # Flat-output-pixel budget per tile: larger tiles on 128 MiB parts
    # (v5e/v6e) amortize per-step overhead; 4096 on v7x (64 MiB / TensorCore).
    return 8192 if _vmem_capacity() >= 100 * 1024 * 1024 else 4096


def _pick_tm(m):
    """Row tile for the layer-1 im2col matmul (power of two, grid >= 2)."""
    tm = 4096 if _vmem_capacity() >= 100 * 1024 * 1024 else 2048
    while tm > 8 and pl.cdiv(m, tm) < 2:
        tm //= 2
    return max(tm, 8)


def _pick_toh(oh, pw):
    """Output-row tile for the direct-conv kernel (no divisor constraint)."""
    toh = max(1, min(oh, _max_pixels() // pw))
    # >= 2 tiles per image when possible so the cross-tile DMA prefetch has
    # something to hide behind.
    if pl.cdiv(oh, toh) < 2 and toh > 1:
        toh = (toh + 1) // 2
    return toh


# -------------------- direct conv (+GDN) kernel, layers 2-4 ------------------

def _accumulate_taps(phases_hbm, w_ref, xbuf, sem, *, toh, pw, rows):
    """Double-buffered fetch of this tile's 4 phase row-bands (+halo) and
    accumulation of the 25 taps as (pixels, Cin) @ (Cin, Cout) MXU matmuls."""
    ni = pl.program_id(0)
    ti = pl.program_id(1)
    nt = pl.num_programs(1)
    npix = toh * pw
    slot = ti % 2

    def issue(tile_idx, slot_idx):
        row0 = pl.multiple_of(tile_idx * npix, 8)
        for pq in range(4):
            pltpu.make_async_copy(
                phases_hbm.at[ni, pq, pl.ds(row0, rows), :],
                xbuf.at[slot_idx, pq],
                sem.at[slot_idx, pq]).start()

    @pl.when(ti == 0)          # first tile of this image: fetch our own rows
    def _():
        issue(ti, slot)

    @pl.when(ti + 1 < nt)      # prefetch next tile into the other slot
    def _():
        issue(ti + 1, 1 - slot)

    xv = xbuf.at[slot]
    acc = None
    for pq in range(4):        # phase (row-parity p, col-parity q)
        p, q = pq // 2, pq % 2
        # Wait only for the phase about to be used; the remaining phase DMAs
        # keep streaming underneath this phase's matmuls.
        pltpu.make_async_copy(
            phases_hbm.at[ni, pq, pl.ds(0, rows), :],
            xbuf.at[slot, pq],
            sem.at[slot, pq]).wait()
        for i in range(3 if p == 0 else 2):
            for j in range(3 if q == 0 else 2):
                kh = p + 2 * i
                kw = q + 2 * j
                base = i * pw + j
                lhs = xv[pq, pl.ds(base, npix), :]          # (npix, Cin) bf16
                part = jnp.dot(lhs, w_ref[kh * KSIZE + kw],
                               preferred_element_type=jnp.float32)
                acc = part if acc is None else acc + part
    return acc                  # (npix, Cout) f32


def _dconv_gdn_kernel(phases_hbm, w_ref, b_ref, g_ref, beta_ref, o_ref,
                      xbuf, sem, *, toh, pw, rows):
    z = _accumulate_taps(phases_hbm, w_ref, xbuf, sem,
                         toh=toh, pw=pw, rows=rows) + b_ref[...]
    z2 = (z * z).astype(jnp.bfloat16)
    denom = jnp.dot(z2, g_ref[...],
                    preferred_element_type=jnp.float32) + beta_ref[...]
    o_ref[0] = (z * jax.lax.rsqrt(denom)).astype(o_ref.dtype)


def _dconv_kernel(phases_hbm, w_ref, b_ref, o_ref, xbuf, sem,
                  *, toh, pw, rows):
    z = _accumulate_taps(phases_hbm, w_ref, xbuf, sem,
                         toh=toh, pw=pw, rows=rows) + b_ref[...]
    o_ref[0] = z.astype(o_ref.dtype)


def conv_layer_direct(x, valid_hw, w, b, gamma, beta, out_dtype):
    """k=5 / s=2 / p=2 conv (+ optional fused GDN) without materialized im2col.

    `x` is (N, H', W', Cin) where only the top-left `valid_hw` region is real
    data (a previous direct layer hands its flat junk-column output straight
    through).  Returns (y4d, oh, ow) with y4d = (N, oh_pad, pw, Cout); columns
    >= ow and rows >= oh are junk."""
    n = x.shape[0]
    cin = x.shape[-1]
    h, wd = valid_hw
    cout = w.shape[-1]
    oh, ow = (h + 1) // 2, (wd + 1) // 2
    pw = _round_up(ow + 2, 8)              # phase width, sublane aligned
    toh = _pick_toh(oh, pw)
    oh_pad = _round_up(oh, toh)
    npix = toh * pw
    rows = (toh + 2) * pw + 8              # per-tile phase rows: halo + slack
    rr = oh_pad + 3                        # phase rows stored in HBM

    # One pad supplies the conv halo, the even/odd phase-split geometry and
    # the flat-layout slack; the 4-phase strided gather below is pure data
    # movement that XLA fuses with the slice+pad.
    xvalid = x[:, :h, :wd, :]
    xp = jnp.pad(xvalid, ((0, 0), (PAD, 2 * rr - PAD - h),
                          (PAD, 2 * pw - PAD - wd), (0, 0)))
    phases = jnp.stack([xp[:, p::2, q::2, :] for p in (0, 1) for q in (0, 1)],
                       axis=1)                              # (N, 4, rr, pw, C)
    phases = phases.reshape(n, 4, rr * pw, cin)

    w_taps = w.reshape(KSIZE * KSIZE, cin, cout).astype(jnp.bfloat16)
    bias = b.reshape(1, cout).astype(jnp.float32)

    # Grid-invariant operands live whole in VMEM (single copy); the phase
    # tensor stays in HBM and is DMA'd manually with double buffering.
    in_specs = [
        pl.BlockSpec(memory_space=pl.ANY),                    # phases (HBM)
        pl.BlockSpec(memory_space=pltpu.MemorySpace.VMEM),    # conv taps
        pl.BlockSpec(memory_space=pltpu.MemorySpace.VMEM),    # bias
    ]
    args = [phases, w_taps, bias]
    if gamma is not None:
        in_specs += [pl.BlockSpec(memory_space=pltpu.MemorySpace.VMEM),
                     pl.BlockSpec(memory_space=pltpu.MemorySpace.VMEM)]
        args += [gamma.astype(jnp.bfloat16),
                 beta.reshape(1, cout).astype(jnp.float32)]
        body = functools.partial(_dconv_gdn_kernel, toh=toh, pw=pw, rows=rows)
    else:
        body = functools.partial(_dconv_kernel, toh=toh, pw=pw, rows=rows)

    yflat = pl.pallas_call(
        body,
        out_shape=jax.ShapeDtypeStruct((n, oh_pad * pw, cout), out_dtype),
        grid=(n, oh_pad // toh),
        in_specs=in_specs,
        out_specs=pl.BlockSpec((1, npix, cout), lambda ni, ti: (ni, ti, 0)),
        scratch_shapes=[pltpu.VMEM((2, 4, rows, cin), jnp.bfloat16),
                        pltpu.SemaphoreType.DMA((2, 4))],
        compiler_params=pltpu.CompilerParams(
            # The tile axis must stay on one core: its DMAs are prefetched
            # sequentially (slot = ti % 2, self-issue only at ti == 0).
            dimension_semantics=("parallel", "arbitrary"),
            vmem_limit_bytes=_vmem_limit_bytes()),
    )(*args)
    return yflat.reshape(n, oh_pad, pw, cout), oh, ow


# ---------------------- im2col matmul (+GDN) kernel, layer 1 -----------------

def _matmul_gdn_kernel(p_ref, w_ref, b_ref, g_ref, beta_ref, o_ref):
    z = jnp.dot(p_ref[...], w_ref[...],
                preferred_element_type=jnp.float32) + b_ref[...]
    z2 = (z * z).astype(jnp.bfloat16)
    denom = jnp.dot(z2, g_ref[...],
                    preferred_element_type=jnp.float32) + beta_ref[...]
    o_ref[...] = (z * jax.lax.rsqrt(denom)).astype(o_ref.dtype)


def conv_layer_im2col(x, valid_hw, w, b, gamma, beta, out_dtype):
    """Layer-1 path (Cin=2): im2col at K = 25*Cin = 50 (no HBM K padding) +
    one fused matmul + GDN."""
    n = x.shape[0]
    cin = x.shape[-1]
    h, wd = valid_hw
    cout = w.shape[-1]
    oh, ow = (h + 1) // 2, (wd + 1) // 2
    xvalid = x[:, :h, :wd, :]
    xp = jnp.pad(xvalid, ((0, 0), (PAD, PAD + (h % 2)),
                          (PAD, PAD + (wd % 2)), (0, 0)))
    cols = [xp[:, kh::STRIDE, kw::STRIDE, :][:, :oh, :ow, :]
            for kh in range(KSIZE) for kw in range(KSIZE)]
    patches = jnp.concatenate(cols, axis=-1).reshape(n * oh * ow,
                                                     KSIZE * KSIZE * cin)
    m, k = patches.shape
    w_mat = w.reshape(k, cout).astype(jnp.bfloat16)

    tm = _pick_tm(m)
    m_pad = pl.cdiv(m, tm) * tm
    if m_pad != m:
        patches = jnp.pad(patches, ((0, m_pad - m), (0, 0)))

    out = pl.pallas_call(
        _matmul_gdn_kernel,
        out_shape=jax.ShapeDtypeStruct((m_pad, cout), out_dtype),
        grid=(m_pad // tm,),
        in_specs=[pl.BlockSpec((tm, k), lambda i: (i, 0)),
                  pl.BlockSpec(memory_space=pltpu.MemorySpace.VMEM),
                  pl.BlockSpec(memory_space=pltpu.MemorySpace.VMEM),
                  pl.BlockSpec(memory_space=pltpu.MemorySpace.VMEM),
                  pl.BlockSpec(memory_space=pltpu.MemorySpace.VMEM)],
        out_specs=pl.BlockSpec((tm, cout), lambda i: (i, 0)),
        compiler_params=pltpu.CompilerParams(
            dimension_semantics=("parallel",),
            vmem_limit_bytes=_vmem_limit_bytes()),
    )(patches, w_mat, b.reshape(1, cout).astype(jnp.float32),
      gamma.astype(jnp.bfloat16), beta.reshape(1, cout).astype(jnp.float32))
    return out[:m].reshape(n, oh, ow, cout), oh, ow


# ------------------------------ forward / params -----------------------------

def mv_encoder_forward(x_nchw, params):
    x = jnp.transpose(x_nchw, (0, 2, 3, 1)).astype(jnp.bfloat16)  # NHWC bf16
    h, wd = x.shape[1], x.shape[2]
    n_layers = len(params)
    for li, layer in enumerate(params):
        out_dtype = jnp.float32 if li == n_layers - 1 else jnp.bfloat16
        gamma = layer.get("gamma")
        beta = layer.get("beta")
        cin = x.shape[-1]
        if cin * KSIZE * KSIZE <= 128 and gamma is not None:
            # Degenerate Cin (layer 1): im2col path.
            x, h, wd = conv_layer_im2col(x, (h, wd), layer["w"], layer["b"],
                                         gamma, beta, out_dtype)
        else:
            x, h, wd = conv_layer_direct(x, (h, wd), layer["w"], layer["b"],
                                         gamma, beta, out_dtype)
    y = x[:, :h, :wd, :]                    # drop flat-layout junk rows/cols
    return jnp.transpose(y, (0, 3, 1, 2))   # back to NCHW


def init_params(key):
    # (Cin, Cout, has_gdn) mirroring MVEncoder.__init__ (out_channel_N = M = 192)
    specs = [(2, 192, True), (192, 192, True), (192, 192, True), (192, 192, False)]
    params = []
    for cin, cout, has_gdn in specs:
        key, kw_, kb, kg = jax.random.split(key, 4)
        fan_in = cin * KSIZE * KSIZE
        w = jax.random.normal(kw_, (KSIZE, KSIZE, cin, cout),
                              jnp.float32) / jnp.sqrt(fan_in)
        b = 0.01 * jax.random.normal(kb, (cout,), jnp.float32)
        layer = {"w": w, "b": b}
        if has_gdn:
            # Stored as the transpose of PyTorch GDN's (out, in) weight.
            gamma = (0.1 * jnp.eye(cout, dtype=jnp.float32)
                     + 0.001 * jax.random.uniform(kg, (cout, cout), jnp.float32))
            layer["gamma"] = gamma
            layer["beta"] = jnp.ones((cout,), jnp.float32)
        params.append(layer)
    return params


def reference_forward(x_nchw, params):
    """Pure-JAX reference (conv k5/s2/p2 + GDN) mirroring the bf16/f32 mix."""
    x = jnp.transpose(x_nchw, (0, 2, 3, 1)).astype(jnp.bfloat16)
    for layer in params:
        z = jax.lax.conv_general_dilated(
            x, layer["w"].astype(jnp.bfloat16), (STRIDE, STRIDE),
            [(PAD, PAD), (PAD, PAD)],
            dimension_numbers=("NHWC", "HWIO", "NHWC"),
            preferred_element_type=jnp.float32)
        z = z + layer["b"][None, None, None, :]
        if "gamma" in layer:
            z2 = (z * z).astype(jnp.bfloat16)
            denom = jnp.einsum("nhwc,cd->nhwd", z2,
                               layer["gamma"].astype(jnp.bfloat16),
                               preferred_element_type=jnp.float32)
            denom = denom + layer["beta"][None, None, None, :]
            x = (z * jax.lax.rsqrt(denom)).astype(jnp.bfloat16)
        else:
            x = z.astype(jnp.float32)
    return jnp.transpose(x, (0, 3, 1, 2))


# -------------------------------- main ---------------------------------------

if __name__ == "__main__":
    key = jax.random.PRNGKey(0)
    kx, kp, kx2 = jax.random.split(key, 3)
    params = init_params(kp)

    # PyTorch-style NCHW input: batch=2, 2 motion-vector channels, 16x16.
    x = jax.random.normal(kx, (2, 2, 16, 16), jnp.float32)
    out = jax.block_until_ready(mv_encoder_forward(x, params))
    # 16 -> 8 -> 4 -> 2 -> 1 spatially, 192 output channels
    assert out.shape == (2, 192, 1, 1), out.shape
    assert out.dtype == jnp.float32, out.dtype
    ref = reference_forward(x, params)
    assert jnp.allclose(out, ref, atol=2e-2, rtol=2e-2), \
        float(jnp.max(jnp.abs(out - ref)))

    # Odd spatial dims, non-divisor row tiles and multi-tile DMA prefetch.
    x2 = jax.random.normal(kx2, (1, 2, 22, 36), jnp.float32)
    out2 = jax.block_until_ready(mv_encoder_forward(x2, params))
    assert out2.shape == (1, 192, 2, 3), out2.shape
    ref2 = reference_forward(x2, params)
    assert jnp.allclose(out2, ref2, atol=2e-2, rtol=2e-2), \
        float(jnp.max(jnp.abs(out2 - ref2)))

    print("KERNEL_OK")
</pallas_src>

<mosaic_0001>
module attributes {stable_mosaic.version = 11 : i64} {
  func.func @_matmul_gdn_kernel(%arg0: i32, %arg1: memref<64x50xbf16, #tpu.memory_space<vmem>>, %arg2: memref<50x192xbf16, #tpu.memory_space<vmem>>, %arg3: memref<1x192xf32, #tpu.memory_space<vmem>>, %arg4: memref<192x192xbf16, #tpu.memory_space<vmem>>, %arg5: memref<1x192xf32, #tpu.memory_space<vmem>>, %arg6: memref<64x192xbf16, #tpu.memory_space<vmem>>) attributes {dimension_semantics = [#tpu.dimension_semantics<parallel>], iteration_bounds = array<i64: 2>, scalar_prefetch = 0 : i64, scratch_operands = 0 : i64, tpu.core_type = #tpu.core_type<tc>, window_params = [{transform_indices = @transform_0, window_bounds = array<i64: 64, 50>}, {pipeline_mode = #tpu.pipeline_mode<synchronous>, transform_indices = @transform_1, window_bounds = array<i64: 50, 192>}, {pipeline_mode = #tpu.pipeline_mode<synchronous>, transform_indices = @transform_2, window_bounds = array<i64: 1, 192>}, {pipeline_mode = #tpu.pipeline_mode<synchronous>, transform_indices = @transform_3, window_bounds = array<i64: 192, 192>}, {pipeline_mode = #tpu.pipeline_mode<synchronous>, transform_indices = @transform_4, window_bounds = array<i64: 1, 192>}, {transform_indices = @transform_5, window_bounds = array<i64: 64, 192>}]} {
    %c0 = arith.constant 0 : index
    %c0_0 = arith.constant 0 : index
    %0 = vector.load %arg1[%c0, %c0_0] : memref<64x50xbf16, #tpu.memory_space<vmem>>, vector<64x50xbf16>
    %c0_1 = arith.constant 0 : index
    %c0_2 = arith.constant 0 : index
    %1 = vector.load %arg2[%c0_1, %c0_2] : memref<50x192xbf16, #tpu.memory_space<vmem>>, vector<50x192xbf16>
    %cst = arith.constant dense<0.000000e+00> : vector<64x192xf32>
    %2 = tpu.matmul %0, %1, %cst {dimension_numbers = #tpu.dot_dimension_numbers<[1], [0], [0], [1], [0, 0, 1, 1], [], []>} : vector<64x50xbf16>, vector<50x192xbf16>, vector<64x192xf32> -> vector<64x192xf32>
    %c0_3 = arith.constant 0 : index
    %c0_4 = arith.constant 0 : index
    %3 = vector.load %arg3[%c0_3, %c0_4] : memref<1x192xf32, #tpu.memory_space<vmem>>, vector<1x192xf32>
    %4 = vector.broadcast %3 : vector<1x192xf32> to vector<64x192xf32>
    %5 = arith.addf %2, %4 : vector<64x192xf32>
    %6 = arith.mulf %5, %5 : vector<64x192xf32>
    %7 = arith.truncf %6 : vector<64x192xf32> to vector<64x192xbf16>
    %c0_5 = arith.constant 0 : index
    %c0_6 = arith.constant 0 : index
    %8 = vector.load %arg4[%c0_5, %c0_6] : memref<192x192xbf16, #tpu.memory_space<vmem>>, vector<192x192xbf16>
    %cst_7 = arith.constant dense<0.000000e+00> : vector<64x192xf32>
    %9 = tpu.matmul %7, %8, %cst_7 {dimension_numbers = #tpu.dot_dimension_numbers<[1], [0], [0], [1], [0, 0, 1, 1], [], []>} : vector<64x192xbf16>, vector<192x192xbf16>, vector<64x192xf32> -> vector<64x192xf32>
    %c0_8 = arith.constant 0 : index
    %c0_9 = arith.constant 0 : index
    %10 = vector.load %arg5[%c0_8, %c0_9] : memref<1x192xf32, #tpu.memory_space<vmem>>, vector<1x192xf32>
    %11 = vector.broadcast %10 : vector<1x192xf32> to vector<64x192xf32>
    %12 = arith.addf %9, %11 : vector<64x192xf32>
    %13 = math.rsqrt %12 : vector<64x192xf32>
    %14 = arith.mulf %5, %13 : vector<64x192xf32>
    %15 = arith.truncf %14 : vector<64x192xf32> to vector<64x192xbf16>
    %c0_10 = arith.constant 0 : index
    %c0_11 = arith.constant 0 : index
    %16 = vector.load %arg6[%c0_10, %c0_11] : memref<64x192xbf16, #tpu.memory_space<vmem>>, vector<64x192xbf16>
    tpu.vector_store %arg6[%c0_10, %c0_11], %15 {strides = array<i32>} : memref<64x192xbf16, #tpu.memory_space<vmem>>, vector<64x192xbf16>,
    return
  }
  func.func @transform_0(%arg0: i32) -> (i32, i32) {
    %c0_i32 = arith.constant 0 : i32
    %c0_i32_0 = arith.constant 0 : i32
    return %arg0, %c0_i32 : i32, i32
  }
  func.func @transform_1(%arg0: i32) -> (i32, i32) {
    %c0_i32 = arith.constant 0 : i32
    %c0_i32_0 = arith.constant 0 : i32
    %c0_i32_1 = arith.constant 0 : i32
    return %c0_i32, %c0_i32_0 : i32, i32
  }
  func.func @transform_2(%arg0: i32) -> (i32, i32) {
    %c0_i32 = arith.constant 0 : i32
    %c0_i32_0 = arith.constant 0 : i32
    %c0_i32_1 = arith.constant 0 : i32
    return %c0_i32, %c0_i32_0 : i32, i32
  }
  func.func @transform_3(%arg0: i32) -> (i32, i32) {
    %c0_i32 = arith.constant 0 : i32
    %c0_i32_0 = arith.constant 0 : i32
    %c0_i32_1 = arith.constant 0 : i32
    return %c0_i32, %c0_i32_0 : i32, i32
  }
  func.func @transform_4(%arg0: i32) -> (i32, i32) {
    %c0_i32 = arith.constant 0 : i32
    %c0_i32_0 = arith.constant 0 : i32
    %c0_i32_1 = arith.constant 0 : i32
    return %c0_i32, %c0_i32_0 : i32, i32
  }
  func.func @transform_5(%arg0: i32) -> (i32, i32) {
    %c0_i32 = arith.constant 0 : i32
    %c0_i32_0 = arith.constant 0 : i32
    return %arg0, %c0_i32 : i32, i32
  }
}

</mosaic_0001>

<bundles_post_ra>
// kernel: tpu_custom_call.1
= control target key start
LH: loop header
LB: loop body
LE: loop exit
PB: predicated region body
PF: predicated region fallthrough
CT: control target
= control target key end

     0   :  { %10 = vsyncpa [#allocation3], 0  ;;  %s1127_s18 = smov 0   ;;  %s1377_s0 = inlined_call_operand.vmem [shape: bf16[128,50], index: 0, kind: input, shape index: {}]   ;;  %s1378_s1 = inlined_call_operand.vmem [shape: bf16[50,192], index: 1, kind: input, shape index: {}]   ;;  %s1379_s2 = inlined_call_operand.vmem [shape: f32[1,192], index: 2, kind: input, shape index: {}]   ;;  %s1380_s3 = inlined_call_operand.hbm [shape: bf16[192,192], index: 3, kind: input, shape index: {}]   ;;  %s1381_s4 = inlined_call_operand.vmem [shape: f32[1,192], index: 4, kind: input, shape index: {}]   ;;  %s1382_s5 = inlined_call_operand.vmem [shape: bf16[128,192], index: 5, kind: output, shape index: {}]  }
   0x1 LB: > { %s848_s19 = sadd.s32 4294967295, %s1091_s18   ;;  %p850_p0 = scmp.ge.s32.totalorder %s1091_s18, 1  ;;  %s1091_s18 = sphi %s1127_s18, %s16_s18  }
   0x2   : > { %p157_p1 = scmp.lt.s32.totalorder %s1091_s18, 3  ;;  %s1093_s20 = smov [#allocation2]  }
   0x3   : > { %s175_s21 = sshll.u32 %s1093_s20, 4  ;;  %p1141_p3 = scmp.eq.s32.totalorder %s848_s19, 0  ;;  %s176_s21 = int_to_ptr.vmem [resolvable:$true] %s175_s21 }
   0x4   : > { %p1135_p2 = pnand %p850_p0, %p157_p1  ;;  %s1053_s27 = scalar_lea.hbm %s1380_s3, 3072 }
   0x5   : > { %s1387_s23 = scalar_select %p1141_p3, 1, 0 }
   0x6   : > { %s1386_s22 = scalar_select %p1135_p2, 1, 0 }
   0x7   : > { %p952_p4 = pneg %p1135_p2  ;;  %p1054_p6 = scmp.ne.s32.totalorder %s1380_s3, %s1053_s27 }
   0x8   : > { %p1060_p10 = scmp.lt.u32.totalorder %s1053_s27, %s1380_s3 }
   0x9   : > { %p1149_p5 = pnand %p1141_p3, %p952_p4 }
   0xb   : > { %p1055_p7 = pneg %p1149_p5 }
   0xd   : > { %p1056_p8 = pnand %p1055_p7, %p1054_p6 }
   0xf   : > { %p1057_p9 = pneg %p1056_p8 }
  0x11   : > { %p1062_p11 = pnand %p1060_p10, %p1057_p9 }
  0x13   : > { %1065 = shalt.err (!%p1062_p11)
}
  0x14   : > { %s1066_s7 = scalar_lea.vmem %s176_s21, 3072  ;;  %p1074_p1 = scmp.lt.s32.totalorder %s176_s21, %s176_s21 }
  0x15   : > { %p1067_p12 = scmp.ne.s32.totalorder %s176_s21, %s1066_s7  ;;  %p1075_p4 = scmp.lt.s32.totalorder %s1066_s7, %s1066_s7 }
  0x17   : > { %p1069_p13 = pnand %p1067_p12, %p1055_p7  ;;  %p1076_p3 = por %p1075_p4, %p1074_p1 }
  0x19   : > { %p1070_p0 = pneg %p1069_p13 }
  0x1b   : > { %p1077_p2 = pnand %p1076_p3, %p1070_p0 }
  0x1d   : > { %1080 = shalt.err (!%p1077_p2)
}
  0x1e   : > { %s1094_s8 = smov 128   ;;  %s1095_s9 = smov 8  }
  0x1f   : > { %955 = dma.hbm_to_vmem [thread:$0]  (!%p1149_p5), %s1380_s3, 3072, %s176_s21, [#allocation3], %s1094_s8, %s1094_s8, %s1095_s9  }
  0x20   : > { %p1389_p6 = scmp.ne.s32.totalorder %s1386_s22, 0 }
  0x21   : > { %p1390_p8 = scmp.ne.s32.totalorder (!%p1389_p6), %s1387_s23, 0 }
  0x22   : > { %203 = sbr.rel (%p1389_p6) target bundleno = 538 (0x21a), region = 40 }
  0x29   : > { %1086 = dma.done.wait (%p1390_p8), [#allocation3], 3072  }
  0x2a   : > { %1088 = vsyncadd (%p1390_p8), [#allocation3], 4294964224  ;;  %s855_s12 = sshll.u32 %s848_s19, 3  ;;  %v1096_v0 = vmov 0   ;;  %v970_v1 = vld [vmem:[%s1378_s1 + $0x4] ss:$8 sps:$4 sm:$0xff]   ;;  %v263_v39 = vlaneseq }
  0x2b   : > { %380 = vmatprep.mubr.bf16.mxu0 %v1096_v0  ;;  %p233_p2 = scmp.lt.s32.totalorder %s855_s12, 15  ;;  %v972_v2 = vld [vmem:[%s1378_s1] ss:$8 sps:$4 sm:$0xff]   ;;  %348 = vmatprep.subr.bf16.mxu0 %v970_v1  ;;  %v973_v3 = vld [vmem:[%s1378_s1 + $0x14] ss:$8 sps:$4 sm:$0xff]   ;;  %vm341_vm0 = vcmask 1040384  }
  0x2c   : > { %349 = vmatpush1.bf16.msra.mxu0 %v972_v2  ;;  %v975_v4 = vld [vmem:[%s1378_s1 + $0x10] ss:$8 sps:$4 sm:$0xff]   ;;  %v976_v5 = vld [vmem:[%s1378_s1 + $0x24] ss:$8 sps:$4 sm:$0xff]   ;;  %v978_v7 = vld [vmem:[%s1378_s1 + $0x20] ss:$8 sps:$4 sm:$0xff]  }
  0x2d   : > { %s1394_s12 = smov (!%p233_p2, %s855_s12), 15  ;;  %350 = vmatprep.subr.bf16.mxu0 %v973_v3  ;;  %v260_v6 = vld [vmem:[%s1378_s1 + $0x30] sm:$0x11]  ;;  %v987_v10 = vld [vmem:[#allocation2 + $0x4] ss:$8 sps:$4 sm:$0xff]   ;;  %vm328_vm1 = vcmask 408576  }
  0x2e   : > { %s856_s15 = sshll.u32 %s1394_s12, 2  ;;  %v871_v8 = vcombine.high %v260_v6, %v260_v6  ;;  %v870_v9 = vcombine.low %v260_v6, %v260_v6  ;;  %v985_v11 = vld [vmem:[#allocation2] ss:$8 sps:$4 sm:$0xff]   ;;  %v990_v12 = vld [vmem:[#allocation2 + $0x14] ss:$8 sps:$4 sm:$0xff]   ;;  %924 = vmatprep.subr.bf16.mxu1 %v987_v10  ;;  %v1218_v40 = vshrl.u32 %v263_v39, 7 }
  0x2f   : > { %s1196_s25 = scalar_lea.vmem %s1377_s0, %s856_s15  ;;  %936 = vmatpush1.bf16.msra.mxu1 %v985_v11  ;;  %v988_v15 = vld [vmem:[#allocation2 + $0x10] ss:$8 sps:$4 sm:$0xff]   ;;  %v993_v16 = vld [vmem:[#allocation2 + $0x24] ss:$8 sps:$4 sm:$0xff]   ;;  %v991_v17 = vld [vmem:[#allocation2 + $0x20] ss:$8 sps:$4 sm:$0xff]  }
  0x30   : > { %351 = vmatpush1.bf16.msra.mxu0 %v975_v4  ;;  %v343_v13 = vsel %vm341_vm0, %v870_v9, 0  ;;  %925 = vmatprep.subr.bf16.mxu1 %v990_v12  ;;  %v981_v14 = vld [vmem:[%s1196_s25] sm:$0xff]   ;;  %v996_v18 = vld [vmem:[#allocation2 + $0x34] ss:$8 sps:$4 sm:$0xff]   ;;  %v994_v20 = vld [vmem:[#allocation2 + $0x30] ss:$8 sps:$4 sm:$0xff]  }
  0x31   : > { %352 = vmatprep.subr.bf16.mxu0 %v976_v5  ;;  %v982_v19 = vld [vmem:[%s1196_s25 + $0x8] sm:$0xff]   ;;  %v999_v21 = vld [vmem:[#allocation2 + $0x44] ss:$8 sps:$4 sm:$0xff]   ;;  %v997_v22 = vld [vmem:[#allocation2 + $0x40] ss:$8 sps:$4 sm:$0xff]   ;;  %v269_v41 = vsub.s32 1, %v1218_v40 }
  0x32   : > { %v1002_v23 = vld [vmem:[#allocation2 + $0x54] ss:$8 sps:$4 sm:$0xff]   ;;  %v1000_v25 = vld [vmem:[#allocation2 + $0x50] ss:$8 sps:$4 sm:$0xff]   ;;  %v1005_v26 = vld [vmem:[#allocation2 + $0x64] ss:$8 sps:$4 sm:$0xff]  }
  0x33   : > { %937 = vmatpush1.bf16.msra.mxu1 %v988_v15  ;;  %v983_v24 = vld [vmem:[%s1196_s25 + $0x10] sm:$0xff]   ;;  %v1003_v27 = vld [vmem:[#allocation2 + $0x60] ss:$8 sps:$4 sm:$0xff]   ;;  %v1011_v31 = vld [vmem:[#allocation2 + $0x84] ss:$8 sps:$4 sm:$0xff]   ;;  %v265_v43 = vsub.s32 0, %v1218_v40 }
  0x34   : > { %353 = vmatpush1.bf16.msra.mxu0 %v978_v7  ;;  %926 = vmatprep.subr.bf16.mxu1 %v993_v16  ;;  %v1008_v28 = vld [vmem:[#allocation2 + $0x74] ss:$8 sps:$4 sm:$0xff]   ;;  %v984_v29 = vld [vmem:[%s1196_s25 + $0x18] sm:$0xff]   ;;  %v1006_v30 = vld [vmem:[#allocation2 + $0x70] ss:$8 sps:$4 sm:$0xff]   ;;  %vm601_vm2 = vcmask 523264  }
  0x35   : > { %872 = vmatprep.subr.msk.bf16.mxu0 %vm341_vm0, %v871_v8  ;;  %v1009_v32 = vld [vmem:[#allocation2 + $0x80] ss:$8 sps:$4 sm:$0xff]   ;;  %v1014_v33 = vld [vmem:[#allocation2 + $0x94] ss:$8 sps:$4 sm:$0xff]   ;;  %v1012_v34 = vld [vmem:[#allocation2 + $0x90] ss:$8 sps:$4 sm:$0xff]  }
  0x36   : > { %v1017_v35 = vld [vmem:[#allocation2 + $0xa4] ss:$8 sps:$4 sm:$0xff]   ;;  %v1015_v36 = vld [vmem:[#allocation2 + $0xa0] ss:$8 sps:$4 sm:$0xff]   ;;  %v1020_v37 = vld [vmem:[#allocation2 + $0xb4] ss:$8 sps:$4 sm:$0xff]  }
  0x37   : > { %938 = vmatpush1.bf16.msra.mxu1 %v991_v17  ;;  %v1018_v38 = vld [vmem:[#allocation2 + $0xb0] ss:$8 sps:$4 sm:$0xff]   ;;  %v261_v42 = vld [vmem:[%s1379_s2] sm:$0x3]  ;;  %s915_s11 = sshll.u32 %s1394_s12, 3  ;;  %vm767_vm3 = vcmask 1043456  }
  0x38   : > { %355 = vmatpush1.bf16.msra.mxu0 %v343_v13  ;;  %927 = vmatprep.subr.bf16.mxu1 %v996_v18  ;;  %v270_v44 = vrot.slane %v261_v42, %v269_v41  ;;  %v266_v45 = vrot.slane %v261_v42, %v265_v43  ;;  %vm768_vm4 = vcmask 523268   ;;  %s1322_s15 = scalar_lea.vmem %s1382_s5, %s915_s11 }
  0x39   : > { %614 = vmatprep.subr.bf16.mxu0 %v987_v10  ;;  %vm1324_vm5 = vmor %vm768_vm4, %vm767_vm3 }
  0x3b   : > { %873 = vmatmul.mubr.msk.bf16.vlgmr.msra.gmra.mrb[0].mxu0 %vm328_vm1, %v981_v14  ;;  %939 = vmatpush1.bf16.msra.mxu1 %v994_v20 }
  0x3c   : > { %390 = vmatprep.mubr.bf16.mxu0 %v1096_v0  ;;  %615 = vmatpush1.bf16.msra.mxu0 %v985_v11 }
  0x3d   : > { %616 = vmatprep.subr.bf16.mxu0 %v990_v12  ;;  %928 = vmatprep.subr.bf16.mxu1 %v999_v21 }
  0x3f   : > { %940 = vmatpush1.bf16.msra.mxu1 %v997_v22 }
  0x40   : > { %617 = vmatpush1.bf16.msra.mxu0 %v988_v15  ;;  %929 = vmatprep.subr.bf16.mxu1 %v1002_v23 }
  0x41   : > { %618 = vmatprep.subr.bf16.mxu0 %v993_v16 }
  0x43   : > { %874 = vmatmul.mubr.msk.bf16.gmra.mrb[4].mxu0 %vm328_vm1, %v982_v19  ;;  %941 = vmatpush1.bf16.msra.mxu1 %v1000_v25 }
  0x44   : > { %400 = vmatprep.mubr.bf16.mxu0 %v1096_v0  ;;  %619 = vmatpush1.bf16.msra.mxu0 %v991_v17 }
  0x45   : > { %620 = vmatprep.subr.bf16.mxu0 %v996_v18  ;;  %930 = vmatprep.subr.bf16.mxu1 %v1005_v26 }
  0x47   : > { %942 = vmatpush1.bf16.msra.mxu1 %v1003_v27 }
  0x48   : > { %621 = vmatpush1.bf16.msra.mxu0 %v994_v20  ;;  %931 = vmatprep.subr.bf16.mxu1 %v1008_v28 }
  0x49   : > { %622 = vmatprep.subr.bf16.mxu0 %v999_v21 }
  0x4b   : > { %875 = vmatmul.mubr.msk.bf16.gmra.mrb[8].mxu0 %vm328_vm1, %v983_v24  ;;  %943 = vmatpush1.bf16.msra.mxu1 %v1006_v30 }
  0x4c   : > { %410 = vmatprep.mubr.bf16.mxu0 %v1096_v0  ;;  %623 = vmatpush1.bf16.msra.mxu0 %v997_v22 }
  0x4d   : > { %624 = vmatprep.subr.bf16.mxu0 %v1002_v23  ;;  %932 = vmatprep.subr.bf16.mxu1 %v1011_v31 }
  0x4f   : > { %944 = vmatpush1.bf16.msra.mxu1 %v1009_v32 }
  0x50   : > { %625 = vmatpush1.bf16.msra.mxu0 %v1000_v25  ;;  %933 = vmatprep.subr.bf16.mxu1 %v1014_v33 }
  0x51   : > { %626 = vmatprep.subr.bf16.mxu0 %v1005_v26 }
  0x53   : > { %876 = vmatmul.mubr.msk.bf16.gmra.mrb[12].mxu0 %vm328_vm1, %v984_v29  ;;  %945 = vmatpush1.bf16.msra.mxu1 %v1012_v34 }
  0x54   : > { %627 = vmatpush1.bf16.msra.mxu0 %v1003_v27  ;;  %934 = vmatprep.subr.bf16.mxu1 %v1017_v35 }
  0x55   : > { %628 = vmatprep.subr.bf16.mxu0 %v1008_v28 }
  0x57   : > { %946 = vmatpush1.bf16.msra.mxu1 %v1015_v36 }
  0x58   : > { %629 = vmatpush1.bf16.msra.mxu0 %v1006_v30  ;;  %935 = vmatprep.subr.bf16.mxu1 %v1020_v37 }
  0x59   : > { %630 = vmatprep.subr.bf16.mxu0 %v1011_v31 }
  0x5b   : > { %947 = vmatpush1.bf16.msra.mxu1 %v1018_v38 }
  0x5c   : > { %631 = vmatpush1.bf16.msra.mxu0 %v1009_v32 }
  0x5d   : > { %632 = vmatprep.subr.bf16.mxu0 %v1014_v33 }
  0x60   : > { %633 = vmatpush1.bf16.msra.mxu0 %v1012_v34 }
  0x61   : > { %634 = vmatprep.subr.bf16.mxu0 %v1017_v35 }
  0x64   : > { %635 = vmatpush1.bf16.msra.mxu0 %v1015_v36 }
  0x65   : > { %636 = vmatprep.subr.bf16.mxu0 %v1020_v37 }
  0x68   : > { %637 = vmatpush1.bf16.msra.mxu0 %v1018_v38  ;;  %v469_v38 = vld [vmem:[%s1381_s4] sm:$0x3] }
  0x69   : > { %v1302_v39 = vrot.slane %v469_v38, %v265_v43  ;;  %v1306_v42 = vrot.slane %v469_v38, %v269_v41 }
 0x10e   : > { %v382_v46 = vpop.f32.mrb[0].mxu0 }
 0x10f   : > { %v384_v47 = vpop.f32.mrb[1].mxu0  ;;  %v1231_v50 = vadd.f32 %v382_v46, %v266_v45 }
 0x110   : > { %v1229_v48 = vadd.f32 %v384_v47, %v270_v44  ;;  %v386_v49 = vpop.f32.mrb[2].mxu0 }
 0x111   : > { %v1233_v51 = vadd.f32 %v386_v49, %v266_v45  ;;  %v388_v52 = vpop.f32.mrb[3].mxu0  ;;  %v421_v57 = vmul.f32 %v1231_v50, %v1231_v50 }
 0x112   : > { %v1235_v53 = vadd.f32 %v388_v52, %v270_v44  ;;  %v422_v55 = vmul.f32 %v1229_v48, %v1229_v48 }
 0x113   : > { %v423_v54 = vmul.f32 %v1233_v51, %v1233_v51 }
 0x114   : > { %v424_v56 = vmul.f32 %v1235_v53, %v1235_v53 }
 0x115   : > { %v437_v60 = vpack.c.bf16 %v423_v54, %v421_v57 }
 0x116   : > { %v438_v58 = vpack.c.bf16 %v424_v56, %v422_v55  ;;  %v392_v59 = vpop.f32.mrb[4].mxu0 }
 0x117   : > { %v394_v61 = vpop.f32.mrb[5].mxu0  ;;  %v1248_v0 = vadd.f32 %v392_v59, %v266_v45 }
 0x118   : > { %v1245_v62 = vadd.f32 %v394_v61, %v270_v44  ;;  %v396_v63 = vpop.f32.mrb[6].mxu0  ;;  %901 = vmatprep.mubr.msk.bf16.mxu0 %vm601_vm2, %v438_v58 }
 0x119   : > { %v1250_v1 = vadd.f32 %v396_v63, %v266_v45  ;;  %v398_v2 = vpop.f32.mrb[7].mxu0  ;;  %647 = vmatmul.mubr.bf16.vlgmr.msra.gmra.mrb[16].mxu0 %v437_v60  ;;  %v425_v7 = vmul.f32 %v1248_v0, %v1248_v0 }
 0x11a   : > { %v1252_v3 = vadd.f32 %v398_v2, %v270_v44  ;;  %v426_v5 = vmul.f32 %v1245_v62, %v1245_v62 }
 0x11b   : > { %v427_v4 = vmul.f32 %v1250_v1, %v1250_v1 }
 0x11c   : > { %v428_v6 = vmul.f32 %v1252_v3, %v1252_v3 }
 0x11d   : > { %v439_v11 = vpack.c.bf16 %v427_v4, %v425_v7 }
 0x11e   : > { %v402_v8 = vpop.f32.mrb[8].mxu0  ;;  %v440_v9 = vpack.c.bf16 %v428_v6, %v426_v5 }
 0x11f   : > { %v404_v10 = vpop.f32.mrb[9].mxu0  ;;  %v1265_v14 = vadd.f32 %v402_v8, %v266_v45 }
 0x120   : > { %v1262_v12 = vadd.f32 %v404_v10, %v270_v44  ;;  %v406_v13 = vpop.f32.mrb[10].mxu0  ;;  %902 = vmatprep.mubr.msk.bf16.mxu1 %vm601_vm2, %v440_v9 }
 0x121   : > { %v1267_v15 = vadd.f32 %v406_v13, %v266_v45  ;;  %v408_v16 = vpop.f32.mrb[11].mxu0  ;;  %657 = vmatmul.mubr.bf16.vlgmr.msra.gmra.mrb[0].mxu1 %v439_v11  ;;  %v429_v21 = vmul.f32 %v1265_v14, %v1265_v14 }
 0x122   : > { %v1269_v17 = vadd.f32 %v408_v16, %v270_v44  ;;  %v430_v19 = vmul.f32 %v1262_v12, %v1262_v12 }
 0x123   : > { %v431_v18 = vmul.f32 %v1267_v15, %v1267_v15 }
 0x124   : > { %v432_v20 = vmul.f32 %v1269_v17, %v1269_v17 }
 0x125   : > { %v441_v25 = vpack.c.bf16 %v431_v18, %v429_v21 }
 0x126   : > { %v442_v22 = vpack.c.bf16 %v432_v20, %v430_v19  ;;  %v412_v23 = vpop.f32.mrb[12].mxu0 }
 0x127   : > { %v414_v24 = vpop.f32.mrb[13].mxu0  ;;  %v1282_v28 = vadd.f32 %v412_v23, %v266_v45 }
 0x128   : > { %v1279_v26 = vadd.f32 %v414_v24, %v270_v44  ;;  %v416_v27 = vpop.f32.mrb[14].mxu0  ;;  %903 = vmatprep.mubr.msk.bf16.mxu1 %vm601_vm2, %v442_v22 }
 0x129   : > { %v1284_v29 = vadd.f32 %v416_v27, %v266_v45  ;;  %v418_v30 = vpop.f32.mrb[15].mxu0  ;;  %667 = vmatmul.mubr.bf16.gmra.mrb[4].mxu1 %v441_v25  ;;  %v433_v35 = vmul.f32 %v1282_v28, %v1282_v28 }
 0x12a   : > { %v1286_v31 = vadd.f32 %v418_v30, %v270_v44  ;;  %v434_v33 = vmul.f32 %v1279_v26, %v1279_v26 }
 0x12b   : > { %v435_v32 = vmul.f32 %v1284_v29, %v1284_v29 }
 0x12c   : > { %v436_v34 = vmul.f32 %v1286_v31, %v1286_v31 }
 0x12d   : > { %v443_v37 = vpack.c.bf16 %v435_v32, %v433_v35 }
 0x12e   : > { %v444_v36 = vpack.c.bf16 %v436_v34, %v434_v33 }
 0x130   : > { %904 = vmatprep.mubr.msk.bf16.mxu1 %vm601_vm2, %v444_v36 }
 0x131   : > { %677 = vmatmul.mubr.bf16.gmra.mrb[8].mxu1 %v443_v37 }
 0x1ec   : > { %v648_v44 = vpop.f32.mrb[16].mxu0 }
 0x1ed   : > { %v649_v45 = vadd.f32 %v648_v44, %v1302_v39  ;;  %v650_v46 = vpop.f32.mrb[17].mxu0 }
 0x1ee   : > { %v651_v47 = vadd.f32 %v650_v46, %v1306_v42  ;;  %v652_v49 = vpop.f32.mrb[18].mxu0 }
 0x1ef   : > { %1021 = vrsqrt.f32 %v649_v45  ;;  %v653_v52 = vadd.f32 %v652_v49, %v1302_v39  ;;  %v654_v54 = vpop.f32.mrb[19].mxu0 }
 0x1f0   : > { %1023 = vrsqrt.f32 %v651_v47  ;;  %v655_v43 = vadd.f32 %v654_v54, %v1306_v42 }
 0x1f1   : > { %1025 = vrsqrt.f32 %v653_v52 }
 0x1f2   : > { %1027 = vrsqrt.f32 %v655_v43 }
 0x1f4   : > { %v658_v40 = vpop.f32.mrb[0].mxu1 }
 0x1f5   : > { %v659_v41 = vadd.f32 %v658_v40, %v1302_v39  ;;  %v660_v55 = vpop.f32.mrb[1].mxu1 }
 0x1f6   : > { %v661_v56 = vadd.f32 %v660_v55, %v1306_v42  ;;  %v662_v57 = vpop.f32.mrb[2].mxu1 }
 0x1f7   : > { %1029 = vrsqrt.f32 %v659_v41  ;;  %v663_v58 = vadd.f32 %v662_v57, %v1302_v39  ;;  %v664_v59 = vpop.f32.mrb[3].mxu1 }
 0x1f8   : > { %1031 = vrsqrt.f32 %v661_v56  ;;  %v665_v60 = vadd.f32 %v664_v59, %v1306_v42 }
 0x1f9   : > { %v1022_v61 = vpop.eup %1021  ;;  %1033 = vrsqrt.f32 %v663_v58 }
 0x1fa   : > { %v1024_v63 = vpop.eup %1023  ;;  %v703_v2 = vmul.f32 %v1022_v61, %v1231_v50  ;;  %1035 = vrsqrt.f32 %v665_v60 }
 0x1fb   : > { %v1026_v4 = vpop.eup %1025  ;;  %v704_v5 = vmul.f32 %v1024_v63, %v1229_v48 }
 0x1fc   : > { %v1028_v6 = vpop.eup %1027  ;;  %v705_v8 = vmul.f32 %v1026_v4, %v1233_v51  ;;  %v668_v9 = vpop.f32.mrb[4].mxu1 }
 0x1fd   : > { %v916_v50 = vpack.c.bf16 %v704_v5, %v703_v2  ;;  %v706_v10 = vmul.f32 %v1028_v6, %v1235_v53  ;;  %v669_v48 = vadd.f32 %v668_v9, %v1302_v39  ;;  %v670_v11 = vpop.f32.mrb[5].mxu1 }
 0x1fe   : > { %v671_v13 = vadd.f32 %v670_v11, %v1306_v42  ;;  %v672_v16 = vpop.f32.mrb[6].mxu1 }
 0x1ff   : > { %770 = vst.msk [vmem:[%s1322_s15] sm:$0xff] %vm1324_vm5, %v916_v50  ;;  %v917_v18 = vpack.c.bf16 %v706_v10, %v705_v8  ;;  %1037 = vrsqrt.f32 %v669_v48  ;;  %v673_v19 = vadd.f32 %v672_v16, %v1302_v39  ;;  %v674_v20 = vpop.f32.mrb[7].mxu1 }
 0x200   : > { %1039 = vrsqrt.f32 %v671_v13  ;;  %v675_v51 = vadd.f32 %v674_v20, %v1306_v42 }
 0x201   : > { %v1030_v21 = vpop.eup %1029  ;;  %771 = vst.msk [vmem:[%s1322_s15 + $0x8] sm:$0xff] %vm1324_vm5, %v917_v18  ;;  %1041 = vrsqrt.f32 %v673_v19 }
 0x202   : > { %v1032_v53 = vpop.eup %1031  ;;  %v707_v22 = vmul.f32 %v1030_v21, %v1248_v0  ;;  %1043 = vrsqrt.f32 %v675_v51 }
 0x203   : > { %v1034_v23 = vpop.eup %1033  ;;  %v708_v24 = vmul.f32 %v1032_v53, %v1245_v62 }
 0x204   : > { %v1036_v25 = vpop.eup %1035  ;;  %v709_v27 = vmul.f32 %v1034_v23, %v1250_v1  ;;  %v678_v30 = vpop.f32.mrb[8].mxu1 }
 0x205   : > { %v918_v32 = vpack.c.bf16 %v708_v24, %v707_v22  ;;  %v710_v33 = vmul.f32 %v1036_v25, %v1252_v3  ;;  %v679_v34 = vadd.f32 %v678_v30, %v1302_v39  ;;  %v680_v35 = vpop.f32.mrb[9].mxu1 }
 0x206   : > { %v681_v36 = vadd.f32 %v680_v35, %v1306_v42  ;;  %v682_v37 = vpop.f32.mrb[10].mxu1 }
 0x207   : > { %772 = vst.msk [vmem:[%s1322_s15 + $0x10] sm:$0xff] %vm1324_vm5, %v918_v32  ;;  %v919_v0 = vpack.c.bf16 %v710_v33, %v709_v27  ;;  %1045 = vrsqrt.f32 %v679_v34  ;;  %v683_v62 = vadd.f32 %v682_v37, %v1302_v39  ;;  %v684_v1 = vpop.f32.mrb[11].mxu1 }
 0x208   : > { %1047 = vrsqrt.f32 %v681_v36  ;;  %v685_v38 = vadd.f32 %v684_v1, %v1306_v42 }
 0x209   : > { %v1038_v3 = vpop.eup %1037  ;;  %773 = vst.msk [vmem:[%s1322_s15 + $0x18] sm:$0xff] %vm1324_vm5, %v919_v0  ;;  %1049 = vrsqrt.f32 %v683_v62 }
 0x20a   : > { %v1040_v44 = vpop.eup %1039  ;;  %v711_v45 = vmul.f32 %v1038_v3, %v1265_v14  ;;  %1051 = vrsqrt.f32 %v685_v38 }
 0x20b   : > { %v1042_v46 = vpop.eup %1041  ;;  %v712_v47 = vmul.f32 %v1040_v44, %v1262_v12 }
 0x20c   : > { %v1044_v49 = vpop.eup %1043  ;;  %v713_v39 = vmul.f32 %v1042_v46, %v1267_v15 }
 0x20d   : > { %v920_v52 = vpack.c.bf16 %v712_v47, %v711_v45  ;;  %v714_v42 = vmul.f32 %v1044_v49, %v1269_v17 }
 0x20f   : > { %774 = vst.msk [vmem:[%s1322_s15 + $0x20] sm:$0xff] %vm1324_vm5, %v920_v52  ;;  %v921_v54 = vpack.c.bf16 %v714_v42, %v713_v39 }
 0x211   : > { %v1046_v43 = vpop.eup %1045  ;;  %775 = vst.msk [vmem:[%s1322_s15 + $0x28] sm:$0xff] %vm1324_vm5, %v921_v54 }
 0x212   : > { %v1048_v14 = vpop.eup %1047  ;;  %v715_v40 = vmul.f32 %v1046_v43, %v1282_v28 }
 0x213   : > { %v1050_v12 = vpop.eup %1049  ;;  %v716_v41 = vmul.f32 %v1048_v14, %v1279_v26 }
 0x214   : > { %v1052_v55 = vpop.eup %1051  ;;  %v717_v15 = vmul.f32 %v1050_v12, %v1284_v29 }
 0x215   : > { %v922_v56 = vpack.c.bf16 %v716_v41, %v715_v40  ;;  %v718_v17 = vmul.f32 %v1052_v55, %v1286_v31 }
 0x217   : > { %776 = vst.msk [vmem:[%s1322_s15 + $0x30] sm:$0xff] %vm1324_vm5, %v922_v56  ;;  %v923_v57 = vpack.c.bf16 %v718_v17, %v717_v15 }
 0x219   : > { %777 = vst.msk [vmem:[%s1322_s15 + $0x38] sm:$0xff] %vm1324_vm5, %v923_v57 }
 0x21a PF: > { %s16_s18 = sadd.s32 1, %s1091_s18  }
 0x21b   : > { %p13_p3 = scmp.ge.s32.totalorder %s16_s18, 4  }
 0x21d   :  { %15 = sbr.rel (!%p13_p3) target bundleno = 1 (0x1), region = 75 }
 0x224   :  { %802 = vsyncpa [#allocation3], 1 }
 0x225   :  { %804 = vsyncpa [#allocation3 + $0x1], 1 }

</bundles_post_ra>
